<compile_context>
chip_gen: v6e
topology: v6e:2x2x1
jax: 0.10.0
libtpu: 0.0.40
codegen_flags: <defaults>
</compile_context>

<pallas_src>
import jax
import jax.numpy as jnp
from jax.experimental import pallas as pl
from jax.experimental.pallas import tpu as pltpu


def _swiglu_fwd_kernel(e_ref, g_ref, out_ref):
    # Compute in float32 exactly like the Triton kernel, cast back to out dtype.
    e = e_ref[...].astype(jnp.float32)
    g = g_ref[...].astype(jnp.float32)
    out_ref[...] = (e * jax.nn.sigmoid(e) * g).astype(out_ref.dtype)


def _device_vmem_bytes() -> int:
    """Physical VMEM per TensorCore; conservative (v7x-like) if query fails."""
    try:
        return int(pltpu.get_tpu_info().vmem_capacity_bytes)
    except Exception:
        return 64 << 20


def _pick_lane_width(n_elem: int, last_dim: int, cap: int = 2048):
    """Largest lane-dense width that avoids padding. Returns (C, needs_pad)."""
    if last_dim >= 128 and last_dim % 128 == 0 and last_dim <= cap and n_elem % last_dim == 0:
        return last_dim, False
    for c in range(cap, 127, -128):
        if n_elem % c == 0:
            return c, False
    return 512, True  # fall back to a padded slab


def swiglu_forward(
    e: jax.Array,
    g: jax.Array,
    *,
    target_block_bytes: int | None = None,
    vmem_limit_bytes: int | None = None,
) -> jax.Array:
    """SwiGLU forward: e * sigmoid(e) * g, elementwise (any shape)."""
    assert e.shape == g.shape, "e and g must have identical shapes"
    assert e.dtype == g.dtype, "e and g must have the same dtype"

    orig_shape = e.shape
    dtype = e.dtype
    itemsize = jnp.dtype(dtype).itemsize
    n_elem = e.size
    last_dim = orig_shape[-1] if len(orig_shape) else 1

    # ---- per-generation tuning -------------------------------------------
    vmem_cap = _device_vmem_bytes()
    small_vmem = vmem_cap <= (64 << 20)  # v7x: 64 MiB VMEM per TC, 2 TCs/chip
    if target_block_bytes is None:
        target_block_bytes = (4 << 20) if small_vmem else (8 << 20)
    if vmem_limit_bytes is None:
        vmem_limit_bytes = (48 << 20) if small_vmem else (64 << 20)

    # ---- lane-dense 2D slab (zero-copy reshape whenever possible) ---------
    C, needs_pad = _pick_lane_width(n_elem, last_dim)
    rows = pl.cdiv(n_elem, C)
    n_pad = rows * C - n_elem

    e_flat = e.reshape(-1)
    g_flat = g.reshape(-1)
    if needs_pad and n_pad:
        e_flat = jnp.pad(e_flat, (0, n_pad))
        g_flat = jnp.pad(g_flat, (0, n_pad))
    e2 = e_flat.reshape(rows, C)
    g2 = g_flat.reshape(rows, C)

    # ---- row tile: dtype-aware sublane alignment, v7x min-step clamp ------
    align = max(8, 32 // itemsize)  # 8 rows f32, 16 bf16, 32 int8/fp8
    if rows <= align:
        tr = rows  # full-extent block satisfies the (8,128) rule
    else:
        tr = max(align, target_block_bytes // (C * itemsize))
        tr = min(tr, rows)
        if small_vmem:
            # Keep >= ~8 grid steps so the "parallel" axis can be sharded
            # across both v7x TensorCores.
            cap = pl.cdiv(rows, 8)
            if cap >= align:
                tr = min(tr, cap)
        tr = max(align, (tr // align) * align)  # ragged last block is masked

    grid = (pl.cdiv(rows, tr),)

    cost = pl.CostEstimate(
        flops=3 * n_elem,
        transcendentals=n_elem,
        bytes_accessed=3 * n_elem * itemsize,
    )

    out2 = pl.pallas_call(
        _swiglu_fwd_kernel,
        out_shape=jax.ShapeDtypeStruct((rows, C), dtype),
        grid_spec=pltpu.PrefetchScalarGridSpec(
            num_scalar_prefetch=0,
            grid=grid,
            in_specs=[
                pl.BlockSpec((tr, C), lambda i: (i, 0)),
                pl.BlockSpec((tr, C), lambda i: (i, 0)),
            ],
            out_specs=pl.BlockSpec((tr, C), lambda i: (i, 0)),
        ),
        compiler_params=pltpu.CompilerParams(
            dimension_semantics=("parallel",),
            vmem_limit_bytes=vmem_limit_bytes,
        ),
        cost_estimate=cost,
    )(e2, g2)

    out_flat = out2.reshape(-1)
    if needs_pad and n_pad:
        out_flat = out_flat[:n_elem]
    return out_flat.reshape(orig_shape)


class TritonSwiglu:
    """JAX/Pallas equivalent of the PyTorch TritonSwiglu module (forward only)."""
    # TODO(synk): backward pass (and the sigmoid/f residual buffers saved for
    # autograd) not implemented; forward-only per the task spec.

    def __call__(self, e: jax.Array, g: jax.Array) -> jax.Array:
        return swiglu_forward(e, g)


if __name__ == "__main__":
    key = jax.random.PRNGKey(0)
    ke, kg, k3 = jax.random.split(key, 3)

    mod = TritonSwiglu()

    # Shapes consistent with the forward: [batch, seq, hidden]
    B, S, H = 2, 8, 32
    e = jax.random.normal(ke, (B, S, H), dtype=jnp.float32)
    g = jax.random.normal(kg, (B, S, H), dtype=jnp.float32)
    out = mod(e, g)
    jax.block_until_ready(out)
    ref = (e * jax.nn.sigmoid(e)) * g
    assert out.shape == (B, S, H)
    assert out.dtype == e.dtype
    assert jnp.allclose(out, ref, atol=1e-5, rtol=1e-5)

    # Ragged total size (exercises the padding fallback path).
    B2, S2, H2 = 3, 7, 100
    k2e, k2g = jax.random.split(kg)
    e2 = jax.random.normal(k2e, (B2, S2, H2), dtype=jnp.float32)
    g2 = jax.random.normal(k2g, (B2, S2, H2), dtype=jnp.float32)
    out2 = mod(e2, g2)
    jax.block_until_ready(out2)
    ref2 = (e2 * jax.nn.sigmoid(e2)) * g2
    assert out2.shape == (B2, S2, H2)
    assert jnp.allclose(out2, ref2, atol=1e-5, rtol=1e-5)

    # bf16 with a lane-aligned hidden dim (zero-copy path, 16-row alignment).
    e3 = jax.random.normal(k3, (4, 16, 256), dtype=jnp.bfloat16)
    g3 = jax.random.normal(kg, (4, 16, 256), dtype=jnp.bfloat16)
    out3 = mod(e3, g3)
    jax.block_until_ready(out3)
    e3f, g3f = e3.astype(jnp.float32), g3.astype(jnp.float32)
    ref3 = (e3f * jax.nn.sigmoid(e3f) * g3f).astype(jnp.bfloat16)
    assert out3.dtype == jnp.bfloat16
    assert jnp.allclose(out3.astype(jnp.float32), ref3.astype(jnp.float32),
                        atol=2e-2, rtol=2e-2)

    print("KERNEL_OK")
</pallas_src>

<mosaic_0001>
module attributes {stable_mosaic.version = 11 : i64} {
  func.func @_swiglu_fwd_kernel(%arg0: i32, %arg1: memref<1x512xf32, #tpu.memory_space<vmem>>, %arg2: memref<1x512xf32, #tpu.memory_space<vmem>>, %arg3: memref<1x512xf32, #tpu.memory_space<vmem>>) attributes {dimension_semantics = [#tpu.dimension_semantics<parallel>], iteration_bounds = array<i64: 1>, scalar_prefetch = 0 : i64, scratch_operands = 0 : i64, tpu.core_type = #tpu.core_type<tc>, window_params = [{transform_indices = @transform_0, window_bounds = array<i64: 1, 512>}, {transform_indices = @transform_1, window_bounds = array<i64: 1, 512>}, {transform_indices = @transform_2, window_bounds = array<i64: 1, 512>}]} {
    %c0 = arith.constant 0 : index
    %c0_0 = arith.constant 0 : index
    %0 = vector.load %arg1[%c0, %c0_0] : memref<1x512xf32, #tpu.memory_space<vmem>>, vector<1x512xf32>
    %c0_1 = arith.constant 0 : index
    %c0_2 = arith.constant 0 : index
    %1 = vector.load %arg2[%c0_1, %c0_2] : memref<1x512xf32, #tpu.memory_space<vmem>>, vector<1x512xf32>
    %2 = arith.negf %0 : vector<1x512xf32>
    %3 = math.exp %2 : vector<1x512xf32>
    %cst = arith.constant 1.000000e+00 : f32
    %4 = vector.broadcast %cst : f32 to vector<1x512xf32>
    %5 = arith.addf %4, %3 : vector<1x512xf32>
    %6 = arith.divf %4, %5 : vector<1x512xf32>
    %7 = arith.mulf %0, %6 : vector<1x512xf32>
    %8 = arith.mulf %7, %1 : vector<1x512xf32>
    %c0_3 = arith.constant 0 : index
    %c0_4 = arith.constant 0 : index
    %9 = vector.load %arg3[%c0_3, %c0_4] : memref<1x512xf32, #tpu.memory_space<vmem>>, vector<1x512xf32>
    tpu.vector_store %arg3[%c0_3, %c0_4], %8 {strides = array<i32>} : memref<1x512xf32, #tpu.memory_space<vmem>>, vector<1x512xf32>,
    return
  }
  func.func @transform_0(%arg0: i32) -> (i32, i32) {
    %c0_i32 = arith.constant 0 : i32
    %c0_i32_0 = arith.constant 0 : i32
    return %arg0, %c0_i32 : i32, i32
  }
  func.func @transform_1(%arg0: i32) -> (i32, i32) {
    %c0_i32 = arith.constant 0 : i32
    %c0_i32_0 = arith.constant 0 : i32
    return %arg0, %c0_i32 : i32, i32
  }
  func.func @transform_2(%arg0: i32) -> (i32, i32) {
    %c0_i32 = arith.constant 0 : i32
    %c0_i32_0 = arith.constant 0 : i32
    return %arg0, %c0_i32 : i32, i32
  }
}

</mosaic_0001>

<bundles_post_ra>
// kernel: tpu_custom_call.1
= control target key start
LH: loop header
LB: loop body
LE: loop exit
PB: predicated region body
PF: predicated region fallthrough
CT: control target
= control target key end

     0   :  { %7 = vsyncpa [#allocation3], 0  ;;  %s168_s0 = inlined_call_operand.hbm [shape: f32[1,512], index: 0, kind: input, shape index: {}]   ;;  %s169_s1 = inlined_call_operand.hbm [shape: f32[1,512], index: 1, kind: input, shape index: {}]   ;;  %s170_s2 = inlined_call_operand.hbm [shape: f32[1,512], index: 2, kind: output, shape index: {}]  }
   0x1   :  { %8 = vsyncpa [#allocation6], 0 }
   0x2   :  { %9 = vsyncpa [#allocation4], 0  ;;  %s141_s9 = smov [#allocation2]   ;;  %s142_s11 = smov [#allocation5]  }
   0x3   :  { %s16_s10 = sshll.u32 %s141_s9, 4  ;;  %s26_s12 = sshll.u32 %s142_s11, 4  ;;  %s17_s10 = int_to_ptr.vmem [resolvable:$true] %s16_s10  ;;  %s27_s12 = int_to_ptr.vmem [resolvable:$true] %s26_s12 }
   0x4   :  { %s83_s13 = scalar_lea.vmem %s17_s10, 64  ;;  %p88_p1 = scmp.lt.s32.totalorder %s17_s10, %s17_s10 }
   0x5   :  { %p84_p0 = scmp.ne.s32.totalorder %s17_s10, %s83_s13  ;;  %p89_p2 = scmp.lt.s32.totalorder %s83_s13, %s83_s13 }
   0x7   :  { %p90_p3 = por %p89_p2, %p88_p1 }
   0x9   :  { %p91_p4 = pnand %p90_p3, %p84_p0 }
   0xb   :  { %94 = shalt.err (!%p91_p4)
}
   0xc   :  { %19 = dma.hbm_to_vmem [thread:$0]  %s168_s0, 64, %s17_s10, [#allocation3]  }
   0xd   :  { %s103_s16 = scalar_lea.vmem %s27_s12, 64  ;;  %p108_p6 = scmp.lt.s32.totalorder %s27_s12, %s27_s12 }
   0xe   :  { %p104_p5 = scmp.ne.s32.totalorder %s27_s12, %s103_s16  ;;  %p109_p7 = scmp.lt.s32.totalorder %s103_s16, %s103_s16 }
  0x10   :  { %p110_p8 = por %p109_p7, %p108_p6 }
  0x12   :  { %p111_p9 = pnand %p110_p8, %p104_p5 }
  0x14   :  { %114 = shalt.err (!%p111_p9)
}
  0x15   :  { %29 = dma.hbm_to_vmem [thread:$0]  %s169_s1, 64, %s27_s12, [#allocation6]  }
  0x16   :  { %135 = dma.done.wait [#allocation3], 64  }
  0x17   :  { %136 = vsyncadd [#allocation3], 4294967232 }
  0x18   :  { %137 = dma.done.wait [#allocation6], 64  }
  0x19   :  { %138 = vsyncadd [#allocation6], 4294967232  ;;  %v36_v0 = vld [vmem:[#allocation2] sm:$0xf]  ;;  %v46_v4 = vlaneseq  ;;  %v37_v6 = vld [vmem:[#allocation5] sm:$0xf] }
  0x1a   :  { %v67_v1 = vmul.f32 -1.442695, %v36_v0  ;;  %s143_s0 = smov [#allocation7]  }
  0x1b   :  { %s57_s19 = sshll.u32 %s143_s0, 4  ;;  %vm48_vm0 = vcmp.lt.s32.totalorder %v46_v4, 512  ;;  %s58_s19 = int_to_ptr.vmem [resolvable:$true] %s57_s19 }
  0x1c   :  { %71 = vpow2.f32 %v67_v1  ;;  %s115_s1 = scalar_lea.vmem %s58_s19, 64  ;;  %p120_p11 = scmp.lt.s32.totalorder %s58_s19, %s58_s19 }
  0x1d   :  { %p116_p10 = scmp.ne.s32.totalorder %s58_s19, %s115_s1  ;;  %p121_p12 = scmp.lt.s32.totalorder %s115_s1, %s115_s1 }
  0x1f   :  { %p122_p13 = por %p121_p12, %p120_p11 }
  0x21   :  { %p123_p0 = pnand %p122_p13, %p116_p10 }
  0x29   :  { %v72_v2 = vpop.eup %71 }
  0x2a   :  { %v41_v3 = vadd.f32 1.0, %v72_v2 }
  0x2c   :  { %73 = vrcp.f32 %v41_v3 }
  0x39   :  { %v74_v5 = vpop.eup %73 }
  0x3a   :  { %v44_v7 = vmul.f32 %v74_v5, %v36_v0 }
  0x3c   :  { %v45_v8 = vmul.f32 %v44_v7, %v37_v6 }
  0x3e   :  { %50 = vst.msk [vmem:[#allocation7] sm:$0xf] %vm48_vm0, %v45_v8 }
  0x3f   :  { %126 = shalt.err (!%p123_p0)
}
  0x40   :  { %60 = dma.vmem_to_hbm [thread:$0]  %s58_s19, 64, %s170_s2, [#allocation4]  }
  0x41   :  { %139 = dma.done.wait [#allocation4], 64  }
  0x42   :  { %140 = vsyncadd [#allocation4], 4294967232 }
  0x43   :  { %64 = vsyncpa [#allocation3], 1 }
  0x44   :  { %65 = vsyncpa [#allocation6], 1 }
  0x45   :  { %66 = vsyncpa [#allocation4], 1 }

</bundles_post_ra>
